<compile_context>
chip_gen: v5e
topology: v5e:2x2
jax: 0.10.0
libtpu: 0.0.40
codegen_flags: <defaults>
</compile_context>

<pallas_src>
import functools

import jax
import jax.numpy as jnp
from jax.experimental import pallas as pl
from jax.experimental.pallas import tpu as pltpu


def _mlp_kernel(x_ref,
                w1_ref, b1_ref,
                w2_ref, b2_ref,
                w3_ref, b3_ref,
                wht_ref, bh_ref,
                out_ref,
                *, hidden_last, num_classes):
    """Processes one (block_m, n_features) batch tile through the fused MLP."""
    mm_dtype = w1_ref.dtype  # bfloat16 matmul inputs, f32 accumulation

    x = x_ref[...]
    if x.dtype != mm_dtype:
        x = x.astype(mm_dtype)

    # layer 1: Linear -> ReLU  (dropout is identity in eval mode)
    a = jnp.dot(x, w1_ref[...], preferred_element_type=jnp.float32) + b1_ref[...]
    a = jnp.maximum(a, 0.0)

    # layer 2
    a = jnp.dot(a.astype(mm_dtype), w2_ref[...],
                preferred_element_type=jnp.float32) + b2_ref[...]
    a = jnp.maximum(a, 0.0)

    # layer 3
    a = jnp.dot(a.astype(mm_dtype), w3_ref[...],
                preferred_element_type=jnp.float32) + b3_ref[...]
    a = jnp.maximum(a, 0.0)                      # (block_m, hidden_last), f32

    # head: hidden_last -> num_classes. With num_classes == 1 an MXU pass is
    # ~99% wasted, so use VPU broadcast-multiply + XLU lane reduction instead.
    if num_classes == 1:
        logits = jnp.sum(a * wht_ref[...].astype(jnp.float32),
                         axis=-1, keepdims=True) + bh_ref[...]
    else:
        logits = jax.lax.dot_general(
            a.astype(mm_dtype), wht_ref[...].astype(mm_dtype),
            dimension_numbers=(((1,), (1,)), ((), ())),
            preferred_element_type=jnp.float32) + bh_ref[...]
    y = jax.nn.sigmoid(logits)

    # Narrow (hidden_last + num_classes)-wide output: h in lanes [0, H),
    # sigmoid(head) in [H, H + C). No dead-lane zero fill.
    H = hidden_last
    out_ref[:, :H] = a.astype(out_ref.dtype)
    out_ref[:, H:] = y.astype(out_ref.dtype)

    # TODO(synk): dropout (training mode) not implemented; forward matches
    # eval semantics where F.dropout is the identity.


def _round_up(n, m):
    return ((n + m - 1) // m) * m


def _choose_block_m(batch, block_m):
    """Pick the per-step row tile.

    * Never pad a small batch up to block_m: clamp to round_up(batch, 8).
    * If the whole (large) batch would otherwise be a single grid step, split
      it in two so the "parallel" grid axis can shard across both v7x
      TensorCores.
    """
    bm = min(block_m, _round_up(batch, 8))
    if batch <= bm and batch >= 1024:
        bm = _round_up(pl.cdiv(batch, 2), 8)
    return bm


def mlp_forward(x, params, *, block_m=1024, interpret=False):
    """params = (w1, b1, w2, b2, w3, b3, wh_t, bh).

    Layer weights w_i: (in, out) bfloat16; biases b_i: (1, out) f32.
    Head weight wh_t: (num_classes, hidden_last) f32; head bias bh: (1, C) f32.
    Returns (h, y) in f32, shapes (batch, hidden_last) and (batch, num_classes).
    """
    w1, b1, w2, b2, w3, b3, wh_t, bh = params
    batch, n_features = x.shape
    hidden_last = w3.shape[1]
    num_classes = wh_t.shape[0]
    out_w = hidden_last + num_classes          # 65-wide output, no pad lanes

    bm = _choose_block_m(batch, block_m)
    num_blocks = pl.cdiv(batch, bm)
    padded = num_blocks * bm
    if padded != batch:
        x = jnp.pad(x, ((0, padded - batch), (0, 0)))

    def row_map(i):
        return (i, 0)

    def const_map(i):
        return (0, 0)

    def full_block(a):
        # Whole array, same block every grid step -> DMA'd once, VMEM-resident.
        return pl.BlockSpec(a.shape, const_map)

    kernel = functools.partial(
        _mlp_kernel, hidden_last=hidden_last, num_classes=num_classes)

    out = pl.pallas_call(
        kernel,
        out_shape=jax.ShapeDtypeStruct((padded, out_w), jnp.float32),
        grid=(num_blocks,),
        in_specs=[
            pl.BlockSpec((bm, n_features), row_map),
            full_block(w1), full_block(b1),
            full_block(w2), full_block(b2),
            full_block(w3), full_block(b3),
            full_block(wh_t), full_block(bh),
        ],
        out_specs=pl.BlockSpec((bm, out_w), row_map),
        compiler_params=pltpu.CompilerParams(
            dimension_semantics=("parallel",),
            vmem_limit_bytes=48 * 1024 * 1024),
        interpret=interpret,
    )(x, w1, b1, w2, b2, w3, b3, wh_t, bh)

    h = out[:batch, :hidden_last]
    y = out[:batch, hidden_last:]
    return h, y


def init_params(key, n_features, mlp_layers=(512, 256, 64), num_classes=1,
                weight_dtype=jnp.bfloat16):
    """Deterministic synthetic init.

    Layer weights returned as (in, out) in `weight_dtype`, biases (1, out) f32.
    Head weight returned pre-transposed as (num_classes, hidden_last) f32.
    """
    dims = [n_features] + list(mlp_layers)
    params = []
    for d_in, d_out in zip(dims[:-1], dims[1:]):
        key, kw, kb = jax.random.split(key, 3)
        scale = 1.0 / jnp.sqrt(jnp.float32(d_in))
        w = jax.random.uniform(kw, (d_in, d_out), jnp.float32, -scale, scale)
        b = jax.random.uniform(kb, (1, d_out), jnp.float32, -scale, scale)
        params += [w.astype(weight_dtype), b]
    # head (kept f32: it feeds the VPU elementwise path, and it is tiny)
    key, kw, kb = jax.random.split(key, 3)
    d_in = dims[-1]
    scale = 1.0 / jnp.sqrt(jnp.float32(d_in))
    wh_t = jax.random.uniform(kw, (num_classes, d_in), jnp.float32, -scale, scale)
    bh = jax.random.uniform(kb, (1, num_classes), jnp.float32, -scale, scale)
    params += [wh_t, bh]
    return tuple(params)


def mlp_reference(x, params):
    """Pure-JAX reference mirroring the kernel's bf16-matmul / f32-acc math."""
    w1, b1, w2, b2, w3, b3, wh_t, bh = params
    a = x
    for w, b in ((w1, b1), (w2, b2), (w3, b3)):
        a = jnp.dot(a.astype(w.dtype), w,
                    preferred_element_type=jnp.float32) + b
        a = jnp.maximum(a, 0.0)
    logits = jnp.dot(a, wh_t.T, preferred_element_type=jnp.float32) + bh
    return a, jax.nn.sigmoid(logits)


if __name__ == "__main__":
    key = jax.random.PRNGKey(0)
    batch, n_features = 8, 32

    key, kx = jax.random.split(key)
    x = jax.random.normal(kx, (batch, n_features), jnp.float32)
    params = init_params(key, n_features, mlp_layers=(512, 256, 64), num_classes=1)

    h, y = mlp_forward(x, params)
    h = jax.block_until_ready(h)
    y = jax.block_until_ready(y)

    h_ref, y_ref = mlp_reference(x, params)
    assert h.shape == (batch, 64) and y.shape == (batch, 1)
    assert jnp.allclose(h, h_ref, atol=2e-3, rtol=2e-3), \
        float(jnp.max(jnp.abs(h - h_ref)))
    assert jnp.allclose(y, y_ref, atol=2e-3, rtol=2e-3), \
        float(jnp.max(jnp.abs(y - y_ref)))

    print("KERNEL_OK")
</pallas_src>

<mosaic_0001>
module attributes {stable_mosaic.version = 11 : i64} {
  func.func @_mlp_kernel(%arg0: i32, %arg1: memref<8x32xf32, #tpu.memory_space<vmem>>, %arg2: memref<32x512xbf16, #tpu.memory_space<vmem>>, %arg3: memref<1x512xf32, #tpu.memory_space<vmem>>, %arg4: memref<512x256xbf16, #tpu.memory_space<vmem>>, %arg5: memref<1x256xf32, #tpu.memory_space<vmem>>, %arg6: memref<256x64xbf16, #tpu.memory_space<vmem>>, %arg7: memref<1x64xf32, #tpu.memory_space<vmem>>, %arg8: memref<1x64xf32, #tpu.memory_space<vmem>>, %arg9: memref<1x1xf32, #tpu.memory_space<vmem>>, %arg10: memref<8x65xf32, #tpu.memory_space<vmem>>) attributes {dimension_semantics = [#tpu.dimension_semantics<parallel>], iteration_bounds = array<i64: 1>, scalar_prefetch = 0 : i64, scratch_operands = 0 : i64, tpu.core_type = #tpu.core_type<tc>, window_params = [{transform_indices = @transform_0, window_bounds = array<i64: 8, 32>}, {pipeline_mode = #tpu.pipeline_mode<synchronous>, transform_indices = @transform_1, window_bounds = array<i64: 32, 512>}, {pipeline_mode = #tpu.pipeline_mode<synchronous>, transform_indices = @transform_2, window_bounds = array<i64: 1, 512>}, {pipeline_mode = #tpu.pipeline_mode<synchronous>, transform_indices = @transform_3, window_bounds = array<i64: 512, 256>}, {pipeline_mode = #tpu.pipeline_mode<synchronous>, transform_indices = @transform_4, window_bounds = array<i64: 1, 256>}, {pipeline_mode = #tpu.pipeline_mode<synchronous>, transform_indices = @transform_5, window_bounds = array<i64: 256, 64>}, {pipeline_mode = #tpu.pipeline_mode<synchronous>, transform_indices = @transform_6, window_bounds = array<i64: 1, 64>}, {pipeline_mode = #tpu.pipeline_mode<synchronous>, transform_indices = @transform_7, window_bounds = array<i64: 1, 64>}, {pipeline_mode = #tpu.pipeline_mode<synchronous>, transform_indices = @transform_8, window_bounds = array<i64: 1, 1>}, {transform_indices = @transform_9, window_bounds = array<i64: 8, 65>}]} {
    %c0 = arith.constant 0 : index
    %c0_0 = arith.constant 0 : index
    %0 = vector.load %arg1[%c0, %c0_0] : memref<8x32xf32, #tpu.memory_space<vmem>>, vector<8x32xf32>
    %1 = arith.truncf %0 : vector<8x32xf32> to vector<8x32xbf16>
    %c0_1 = arith.constant 0 : index
    %c0_2 = arith.constant 0 : index
    %2 = vector.load %arg2[%c0_1, %c0_2] : memref<32x512xbf16, #tpu.memory_space<vmem>>, vector<32x512xbf16>
    %cst = arith.constant dense<0.000000e+00> : vector<8x512xf32>
    %3 = tpu.matmul %1, %2, %cst {dimension_numbers = #tpu.dot_dimension_numbers<[1], [0], [0], [1], [0, 0, 1, 1], [], []>} : vector<8x32xbf16>, vector<32x512xbf16>, vector<8x512xf32> -> vector<8x512xf32>
    %c0_3 = arith.constant 0 : index
    %c0_4 = arith.constant 0 : index
    %4 = vector.load %arg3[%c0_3, %c0_4] : memref<1x512xf32, #tpu.memory_space<vmem>>, vector<1x512xf32>
    %5 = vector.broadcast %4 : vector<1x512xf32> to vector<8x512xf32>
    %6 = arith.addf %3, %5 : vector<8x512xf32>
    %cst_5 = arith.constant 0.000000e+00 : f32
    %7 = vector.broadcast %cst_5 : f32 to vector<8x512xf32>
    %8 = arith.maximumf %6, %7 : vector<8x512xf32>
    %9 = arith.truncf %8 : vector<8x512xf32> to vector<8x512xbf16>
    %c0_6 = arith.constant 0 : index
    %c0_7 = arith.constant 0 : index
    %10 = vector.load %arg4[%c0_6, %c0_7] : memref<512x256xbf16, #tpu.memory_space<vmem>>, vector<512x256xbf16>
    %cst_8 = arith.constant dense<0.000000e+00> : vector<8x256xf32>
    %11 = tpu.matmul %9, %10, %cst_8 {dimension_numbers = #tpu.dot_dimension_numbers<[1], [0], [0], [1], [0, 0, 1, 1], [], []>} : vector<8x512xbf16>, vector<512x256xbf16>, vector<8x256xf32> -> vector<8x256xf32>
    %c0_9 = arith.constant 0 : index
    %c0_10 = arith.constant 0 : index
    %12 = vector.load %arg5[%c0_9, %c0_10] : memref<1x256xf32, #tpu.memory_space<vmem>>, vector<1x256xf32>
    %13 = vector.broadcast %12 : vector<1x256xf32> to vector<8x256xf32>
    %14 = arith.addf %11, %13 : vector<8x256xf32>
    %cst_11 = arith.constant 0.000000e+00 : f32
    %15 = vector.broadcast %cst_11 : f32 to vector<8x256xf32>
    %16 = arith.maximumf %14, %15 : vector<8x256xf32>
    %17 = arith.truncf %16 : vector<8x256xf32> to vector<8x256xbf16>
    %c0_12 = arith.constant 0 : index
    %c0_13 = arith.constant 0 : index
    %18 = vector.load %arg6[%c0_12, %c0_13] : memref<256x64xbf16, #tpu.memory_space<vmem>>, vector<256x64xbf16>
    %cst_14 = arith.constant dense<0.000000e+00> : vector<8x64xf32>
    %19 = tpu.matmul %17, %18, %cst_14 {dimension_numbers = #tpu.dot_dimension_numbers<[1], [0], [0], [1], [0, 0, 1, 1], [], []>} : vector<8x256xbf16>, vector<256x64xbf16>, vector<8x64xf32> -> vector<8x64xf32>
    %c0_15 = arith.constant 0 : index
    %c0_16 = arith.constant 0 : index
    %20 = vector.load %arg7[%c0_15, %c0_16] : memref<1x64xf32, #tpu.memory_space<vmem>>, vector<1x64xf32>
    %21 = vector.broadcast %20 : vector<1x64xf32> to vector<8x64xf32>
    %22 = arith.addf %19, %21 : vector<8x64xf32>
    %cst_17 = arith.constant 0.000000e+00 : f32
    %23 = vector.broadcast %cst_17 : f32 to vector<8x64xf32>
    %24 = arith.maximumf %22, %23 : vector<8x64xf32>
    %c0_18 = arith.constant 0 : index
    %c0_19 = arith.constant 0 : index
    %25 = vector.load %arg8[%c0_18, %c0_19] : memref<1x64xf32, #tpu.memory_space<vmem>>, vector<1x64xf32>
    %26 = vector.broadcast %25 : vector<1x64xf32> to vector<8x64xf32>
    %27 = arith.mulf %24, %26 : vector<8x64xf32>
    %cst_20 = arith.constant dense<0.000000e+00> : vector<8xf32>
    %28 = vector.multi_reduction <add>, %27, %cst_20 [1] : vector<8x64xf32> to vector<8xf32>
    %29 = vector.shape_cast %28 : vector<8xf32> to vector<8x1xf32>
    %c0_21 = arith.constant 0 : index
    %c0_22 = arith.constant 0 : index
    %30 = vector.load %arg9[%c0_21, %c0_22] : memref<1x1xf32, #tpu.memory_space<vmem>>, vector<1x1xf32>
    %31 = vector.broadcast %30 : vector<1x1xf32> to vector<8x1xf32>
    %32 = arith.addf %29, %31 : vector<8x1xf32>
    %33 = arith.negf %32 : vector<8x1xf32>
    %34 = math.exp %33 : vector<8x1xf32>
    %cst_23 = arith.constant 1.000000e+00 : f32
    %35 = vector.broadcast %cst_23 : f32 to vector<8x1xf32>
    %36 = arith.addf %35, %34 : vector<8x1xf32>
    %37 = arith.divf %35, %36 : vector<8x1xf32>
    %c0_24 = arith.constant 0 : index
    %c0_25 = arith.constant 0 : index
    %38 = vector.load %arg10[%c0_24, %c0_25] : memref<8x65xf32, #tpu.memory_space<vmem>>, vector<8x64xf32>
    tpu.vector_store %arg10[%c0_24, %c0_25], %24 {strides = array<i32>} : memref<8x65xf32, #tpu.memory_space<vmem>>, vector<8x64xf32>,
    %c0_26 = arith.constant 0 : index
    %c64 = arith.constant 64 : index
    %39 = vector.load %arg10[%c0_26, %c64] : memref<8x65xf32, #tpu.memory_space<vmem>>, vector<8x1xf32>
    tpu.vector_store %arg10[%c0_26, %c64], %37 {strides = array<i32>} : memref<8x65xf32, #tpu.memory_space<vmem>>, vector<8x1xf32>,
    return
  }
  func.func @transform_0(%arg0: i32) -> (i32, i32) {
    %c0_i32 = arith.constant 0 : i32
    %c0_i32_0 = arith.constant 0 : i32
    return %arg0, %c0_i32 : i32, i32
  }
  func.func @transform_1(%arg0: i32) -> (i32, i32) {
    %c0_i32 = arith.constant 0 : i32
    %c0_i32_0 = arith.constant 0 : i32
    %c0_i32_1 = arith.constant 0 : i32
    return %c0_i32, %c0_i32_0 : i32, i32
  }
  func.func @transform_2(%arg0: i32) -> (i32, i32) {
    %c0_i32 = arith.constant 0 : i32
    %c0_i32_0 = arith.constant 0 : i32
    %c0_i32_1 = arith.constant 0 : i32
    return %c0_i32, %c0_i32_0 : i32, i32
  }
  func.func @transform_3(%arg0: i32) -> (i32, i32) {
    %c0_i32 = arith.constant 0 : i32
    %c0_i32_0 = arith.constant 0 : i32
    %c0_i32_1 = arith.constant 0 : i32
    return %c0_i32, %c0_i32_0 : i32, i32
  }
  func.func @transform_4(%arg0: i32) -> (i32, i32) {
    %c0_i32 = arith.constant 0 : i32
    %c0_i32_0 = arith.constant 0 : i32
    %c0_i32_1 = arith.constant 0 : i32
    return %c0_i32, %c0_i32_0 : i32, i32
  }
  func.func @transform_5(%arg0: i32) -> (i32, i32) {
    %c0_i32 = arith.constant 0 : i32
    %c0_i32_0 = arith.constant 0 : i32
    %c0_i32_1 = arith.constant 0 : i32
    return %c0_i32, %c0_i32_0 : i32, i32
  }
  func.func @transform_6(%arg0: i32) -> (i32, i32) {
    %c0_i32 = arith.constant 0 : i32
    %c0_i32_0 = arith.constant 0 : i32
    %c0_i32_1 = arith.constant 0 : i32
    return %c0_i32, %c0_i32_0 : i32, i32
  }
  func.func @transform_7(%arg0: i32) -> (i32, i32) {
    %c0_i32 = arith.constant 0 : i32
    %c0_i32_0 = arith.constant 0 : i32
    %c0_i32_1 = arith.constant 0 : i32
    return %c0_i32, %c0_i32_0 : i32, i32
  }
  func.func @transform_8(%arg0: i32) -> (i32, i32) {
    %c0_i32 = arith.constant 0 : i32
    %c0_i32_0 = arith.constant 0 : i32
    %c0_i32_1 = arith.constant 0 : i32
    return %c0_i32, %c0_i32_0 : i32, i32
  }
  func.func @transform_9(%arg0: i32) -> (i32, i32) {
    %c0_i32 = arith.constant 0 : i32
    %c0_i32_0 = arith.constant 0 : i32
    return %arg0, %c0_i32 : i32, i32
  }
}

</mosaic_0001>

<bundles_post_ra>
// kernel: tpu_custom_call.1
= control target key start
LH: loop header
LB: loop body
LE: loop exit
PB: predicated region body
PF: predicated region fallthrough
CT: control target
= control target key end

     0   :  { %s1584_s0 = inlined_call_operand.vmem [shape: f32[8,32], index: 0, kind: input, shape index: {}]   ;;  %s1585_s1 = inlined_call_operand.vmem [shape: bf16[32,512], index: 1, kind: input, shape index: {}]   ;;  %s1586_s2 = inlined_call_operand.vmem [shape: f32[1,512], index: 2, kind: input, shape index: {}]   ;;  %s1587_s3 = inlined_call_operand.hbm [shape: bf16[512,256], index: 3, kind: input, shape index: {}]   ;;  %s1588_s4 = inlined_call_operand.vmem [shape: f32[1,256], index: 4, kind: input, shape index: {}]   ;;  %s1589_s5 = inlined_call_operand.vmem [shape: bf16[256,64], index: 5, kind: input, shape index: {}]   ;;  %s1590_s6 = inlined_call_operand.vmem [shape: f32[1,64], index: 6, kind: input, shape index: {}]   ;;  %s1591_s7 = inlined_call_operand.vmem [shape: f32[1,64], index: 7, kind: input, shape index: {}]   ;;  %s1592_s8 = inlined_call_operand.<no memory space> [shape: f32[1,1], index: 8, kind: input, shape index: {}]   ;;  %s1593_s9 = inlined_call_operand.hbm [shape: f32[8,65], index: 9, kind: output, shape index: {}]  }
   0x1   :  { %v14_v0 = vstv %s1592_s8 }
   0x2   :  { %15 = vst [vmem:[#allocation2] sm:$0x1] %v14_v0 }
   0x3   :  { %16 = vsyncpa [#allocation4], 0 }
   0x4   :  { %17 = vsyncpa [#allocation5], 0  ;;  %s28_s13 = sshll.u32 %s1587_s3, 4  ;;  %s1399_s14 = smov [#allocation3]   ;;  %s29_s13 = int_to_ptr.hbm [resolvable:$true] %s28_s13 }
   0x5   :  { %s30_s15 = sshll.u32 %s1399_s14, 4  ;;  %s1400_s16 = smov 128   ;;  %s31_s15 = int_to_ptr.vmem [resolvable:$true] %s30_s15 }
   0x6   :  { %s1401_s17 = smov 8  }
   0x7   :  { %36 = dma.hbm_to_vmem [thread:$0]  %s29_s13, 8192, %s31_s15, [#allocation4], %s1400_s16, %s1400_s16, %s1401_s17  }
   0x8   :  { %1395 = dma.done.wait [#allocation4], 8192  }
   0x9   :  { %1396 = vsyncadd [#allocation4], 4294959104  ;;  %v908_v1 = vld [vmem:[%s1585_s1 + $0x20] sm:$0xf]  ;;  %v1253_v2 = vld [vmem:[%s1585_s1 + $0x2c] sm:$0xf0] }
   0xa   :  { %v1251_v3 = vld [vmem:[%s1585_s1 + $0x24] sm:$0xf]  ;;  %v909_v4 = vor.u32 %v1253_v2, %v908_v1  ;;  %v910_v5 = vld [vmem:[%s1585_s1 + $0x30] sm:$0xf0]  ;;  %v892_v6 = vld [vmem:[%s1585_s1] sm:$0xf] }
   0xb   :  { %v1249_v7 = vld [vmem:[%s1585_s1 + $0xc] sm:$0xf0]  ;;  %v913_v8 = vor.u32 %v1251_v3, %v910_v5  ;;  %v1247_v9 = vld [vmem:[%s1585_s1 + $0x4] sm:$0xf]  ;;  %v894_v10 = vld [vmem:[%s1585_s1 + $0x10] sm:$0xf0] }
   0xc   :  { %v52_v11 = vld [vmem:[%s1584_s0] sm:$0xff]  ;;  %vm112_vm0 = vcmask 261120   ;;  %122 = vmatpush.bf16.msra.mxu2 %v909_v4  ;;  %v893_v12 = vor.u32 %v1249_v7, %v892_v6  ;;  %v916_v13 = vld [vmem:[%s1585_s1 + $0x28] sm:$0xf]  ;;  %v1254_v14 = vld [vmem:[%s1585_s1 + $0x34] sm:$0xf0]  ;;  %v897_v16 = vor.u32 %v1247_v9, %v894_v10 }
   0xd   :  { %v1252_v15 = vld [vmem:[%s1585_s1 + $0x2c] sm:$0xf]  ;;  %135 = vmatpush.bf16.msra.mxu3 %v913_v8  ;;  %v917_v17 = vor.u32 %v1254_v14, %v916_v13  ;;  %v918_v18 = vld [vmem:[%s1585_s1 + $0x38] sm:$0xf0]  ;;  %v900_v19 = vld [vmem:[%s1585_s1 + $0x8] sm:$0xf]  ;;  %v1511_v25 = vpack.c.bf16 %v52_v11, %v52_v11 }
   0xe   :  { %v1250_v20 = vld [vmem:[%s1585_s1 + $0x14] sm:$0xf0]  ;;  %v921_v21 = vor.u32 %v1252_v15, %v918_v18  ;;  %v1248_v22 = vld [vmem:[%s1585_s1 + $0xc] sm:$0xf]  ;;  %v902_v23 = vld [vmem:[%s1585_s1 + $0x18] sm:$0xf0] }
   0xf   :  { %v984_v24 = vld [vmem:[#allocation3 + $0x70] sm:$0xf]  ;;  %v1270_v26 = vld [vmem:[#allocation3 + $0x74] sm:$0xf0]  ;;  %v976_v31 = vld [vmem:[#allocation3 + $0x60] sm:$0xf]  ;;  %v901_v34 = vor.u32 %v1250_v20, %v900_v19  ;;  %v905_v36 = vor.u32 %v1248_v22, %v902_v23 }
  0x10   :  { %v1048_v27 = vld [vmem:[#allocation3 + $0xf0] sm:$0xf]  ;;  %v1286_v28 = vld [vmem:[#allocation3 + $0xf4] sm:$0xf0]  ;;  %123 = vmatpush.bf16.msra.mxu2 %v893_v12  ;;  %v985_v29 = vor.u32 %v1270_v26, %v984_v24  ;;  %v1268_v32 = vld [vmem:[#allocation3 + $0x64] sm:$0xf0] }
  0x11   :  { %v1049_v30 = vor.u32 %v1286_v28, %v1048_v27  ;;  %v1040_v33 = vld [vmem:[#allocation3 + $0xe0] sm:$0xf]  ;;  %136 = vmatpush.bf16.msra.mxu3 %v897_v16  ;;  %v1284_v35 = vld [vmem:[#allocation3 + $0xe4] sm:$0xf0]  ;;  %v977_v37 = vor.u32 %v1268_v32, %v976_v31  ;;  %v968_v39 = vld [vmem:[#allocation3 + $0x50] sm:$0xf] }
  0x12   :  { %566 = vmatpush.bf16.msra.mxu0 %v985_v29  ;;  %v1041_v38 = vor.u32 %v1284_v35, %v1040_v33  ;;  %v1266_v40 = vld [vmem:[#allocation3 + $0x54] sm:$0xf0]  ;;  %v1032_v41 = vld [vmem:[#allocation3 + $0xd0] sm:$0xf]  ;;  %v960_v46 = vld [vmem:[#allocation3 + $0x40] sm:$0xf] }
  0x13   :  { %922 = vmatmul.msk.bf16.vlgmr.msra.gmra.mxu2 %vm112_vm0, %v1511_v25  ;;  %579 = vmatpush.bf16.msra.mxu1 %v1049_v30  ;;  %v1282_v42 = vld [vmem:[#allocation3 + $0xd4] sm:$0xf0]  ;;  %v1112_v43 = vld [vmem:[#allocation3 + $0x170] sm:$0xf]  ;;  %v969_v45 = vor.u32 %v1266_v40, %v968_v39  ;;  %v1264_v51 = vld [vmem:[#allocation3 + $0x44] sm:$0xf0] }
  0x14   :  { %148 = vmatpush.bf16.msrb.mxu2 %v917_v17  ;;  %923 = vmatmul.msk.bf16.vlgmr.msra.gmra.mxu3 %vm112_vm0, %v1511_v25  ;;  %v1302_v44 = vld [vmem:[#allocation3 + $0x174] sm:$0xf0]  ;;  %v1176_v48 = vld [vmem:[#allocation3 + $0x1f0] sm:$0xf]  ;;  %v1033_v50 = vor.u32 %v1282_v42, %v1032_v41  ;;  %v1024_v52 = vld [vmem:[#allocation3 + $0xc0] sm:$0xf]  ;;  %v961_v60 = vor.u32 %v1264_v51, %v960_v46 }
  0x15   :  { %161 = vmatpush.bf16.msrb.mxu3 %v921_v21  ;;  %v1113_v47 = vor.u32 %v1302_v44, %v1112_v43  ;;  %v1318_v49 = vld [vmem:[#allocation3 + $0x1f4] sm:$0xf0]  ;;  %v1280_v53 = vld [vmem:[#allocation3 + $0xc4] sm:$0xf0]  ;;  %v1104_v55 = vld [vmem:[#allocation3 + $0x160] sm:$0xf] }
  0x16   :  { %567 = vmatpush.bf16.msra.mxu0 %v977_v37  ;;  %v1177_v54 = vor.u32 %v1318_v49, %v1176_v48  ;;  %v1300_v56 = vld [vmem:[#allocation3 + $0x164] sm:$0xf0]  ;;  %v1168_v57 = vld [vmem:[#allocation3 + $0x1e0] sm:$0xf]  ;;  %v952_v61 = vld [vmem:[#allocation3 + $0x30] sm:$0xf]  ;;  %v1025_v1 = vor.u32 %v1280_v53, %v1024_v52 }
  0x17   :  { %580 = vmatpush.bf16.msra.mxu1 %v1041_v38  ;;  %v1105_v58 = vor.u32 %v1300_v56, %v1104_v55  ;;  %v1316_v59 = vld [vmem:[#allocation3 + $0x1e4] sm:$0xf0]  ;;  %v1262_v62 = vld [vmem:[#allocation3 + $0x34] sm:$0xf0]  ;;  %v1096_v0 = vld [vmem:[#allocation3 + $0x150] sm:$0xf] }
  0x18   :  { %149 = vmatpush.bf16.msrb.mxu2 %v901_v34  ;;  %v1169_v63 = vor.u32 %v1316_v59, %v1168_v57  ;;  %v1298_v2 = vld [vmem:[#allocation3 + $0x154] sm:$0xf0]  ;;  %v1160_v3 = vld [vmem:[#allocation3 + $0x1d0] sm:$0xf]  ;;  %v1088_v9 = vld [vmem:[#allocation3 + $0x140] sm:$0xf]  ;;  %v953_v11 = vor.u32 %v1262_v62, %v952_v61 }
  0x19   :  { %162 = vmatpush.bf16.msrb.mxu3 %v905_v36  ;;  %v1314_v4 = vld [vmem:[#allocation3 + $0x1d4] sm:$0xf0]  ;;  %v1016_v5 = vld [vmem:[#allocation3 + $0xb0] sm:$0xf]  ;;  %v1097_v7 = vor.u32 %v1298_v2, %v1096_v0  ;;  %v1296_v10 = vld [vmem:[#allocation3 + $0x144] sm:$0xf0] }
  0x1a   :  { %568 = vmatpush.bf16.msra.mxu0 %v969_v45  ;;  %v1278_v6 = vld [vmem:[#allocation3 + $0xb4] sm:$0xf0]  ;;  %v1161_v8 = vor.u32 %v1314_v4, %v1160_v3  ;;  %v1152_v12 = vld [vmem:[#allocation3 + $0x1c0] sm:$0xf]  ;;  %v1312_v13 = vld [vmem:[#allocation3 + $0x1c4] sm:$0xf0]  ;;  %v1089_v19 = vor.u32 %v1296_v10, %v1088_v9 }
  0x1b   :  { %581 = vmatpush.bf16.msra.mxu1 %v1033_v50  ;;  %v1017_v14 = vor.u32 %v1278_v6, %v1016_v5  ;;  %v944_v15 = vld [vmem:[#allocation3 + $0x20] sm:$0xf]  ;;  %v1260_v16 = vld [vmem:[#allocation3 + $0x24] sm:$0xf0]  ;;  %v1153_v20 = vor.u32 %v1312_v13, %v1152_v12  ;;  %v1080_v21 = vld [vmem:[#allocation3 + $0x130] sm:$0xf] }
  0x1c   :  { %592 = vmatpush.bf16.msra.mxu2 %v1113_v47  ;;  %v1008_v17 = vld [vmem:[#allocation3 + $0xa0] sm:$0xf]  ;;  %v1276_v18 = vld [vmem:[#allocation3 + $0xa4] sm:$0xf0]  ;;  %v1294_v22 = vld [vmem:[#allocation3 + $0x134] sm:$0xf0]  ;;  %v945_v23 = vor.u32 %v1260_v16, %v944_v15 }
  0x1d   :  { %605 = vmatpush.bf16.msra.mxu3 %v1177_v54  ;;  %v1144_v24 = vld [vmem:[#allocation3 + $0x1b0] sm:$0xf]  ;;  %v1310_v26 = vld [vmem:[#allocation3 + $0x1b4] sm:$0xf0]  ;;  %v1009_v27 = vor.u32 %v1276_v18, %v1008_v17  ;;  %v1081_v32 = vor.u32 %v1294_v22, %v1080_v21  ;;  %v1072_v34 = vld [vmem:[#allocation3 + $0x120] sm:$0xf] }
  0x1e   :  { %569 = vmatpush.bf16.msra.mxu0 %v961_v60  ;;  %v936_v28 = vld [vmem:[#allocation3 + $0x10] sm:$0xf]  ;;  %v1258_v29 = vld [vmem:[#allocation3 + $0x14] sm:$0xf0]  ;;  %v1145_v33 = vor.u32 %v1310_v26, %v1144_v24  ;;  %v1292_v35 = vld [vmem:[#allocation3 + $0x124] sm:$0xf0] }
  0x1f   :  { %582 = vmatpush.bf16.msra.mxu1 %v1025_v1  ;;  %v1000_v30 = vld [vmem:[#allocation3 + $0x90] sm:$0xf]  ;;  %v1274_v31 = vld [vmem:[#allocation3 + $0x94] sm:$0xf0]  ;;  %v937_v36 = vor.u32 %v1258_v29, %v936_v28  ;;  %v1136_v37 = vld [vmem:[#allocation3 + $0x1a0] sm:$0xf] }
  0x20   :  { %593 = vmatpush.bf16.msra.mxu2 %v1105_v58  ;;  %v1308_v38 = vld [vmem:[#allocation3 + $0x1a4] sm:$0xf0]  ;;  %v1001_v39 = vor.u32 %v1274_v31, %v1000_v30  ;;  %v928_v40 = vld [vmem:[#allocation3] sm:$0xf]  ;;  %v1269_v44 = vld [vmem:[#allocation3 + $0x74] sm:$0xf] }
  0x21   :  { %606 = vmatpush.bf16.msra.mxu3 %v1169_v63  ;;  %v1256_v41 = vld [vmem:[#allocation3 + $0x4] sm:$0xf0]  ;;  %v992_v42 = vld [vmem:[#allocation3 + $0x80] sm:$0xf]  ;;  %v986_v45 = vld [vmem:[#allocation3 + $0x78] sm:$0xf0]  ;;  %v1137_v48 = vor.u32 %v1308_v38, %v1136_v37 }
  0x22   :  { %570 = vmatpush.bf16.msra.mxu0 %v953_v11  ;;  %v1272_v43 = vld [vmem:[#allocation3 + $0x84] sm:$0xf0]  ;;  %v1285_v46 = vld [vmem:[#allocation3 + $0xf4] sm:$0xf]  ;;  %v1050_v47 = vld [vmem:[#allocation3 + $0xf8] sm:$0xf0]  ;;  %v929_v49 = vor.u32 %v1256_v41, %v928_v40  ;;  %v989_v51 = vor.u32 %v1269_v44, %v986_v45 }
  0x23   :  { %924 = vmatmul.msk.bf16.vlgmr.msrb.gmra.mxu2 %vm112_vm0, %v1511_v25  ;;  %583 = vmatpush.bf16.msra.mxu1 %v1017_v14  ;;  %v993_v50 = vor.u32 %v1272_v43, %v992_v42  ;;  %v1053_v52 = vor.u32 %v1285_v46, %v1050_v47  ;;  %v1267_v53 = vld [vmem:[#allocation3 + $0x64] sm:$0xf]  ;;  %v978_v54 = vld [vmem:[#allocation3 + $0x68] sm:$0xf0]  ;;  %v1265_v59 = vld [vmem:[#allocation3 + $0x54] sm:$0xf] }
  0x24   :  { %594 = vmatpush.bf16.msra.mxu2 %v1097_v7  ;;  %925 = vmatmul.msk.bf16.vlgmr.msrb.gmra.mxu3 %vm112_vm0, %v1511_v25  ;;  %v1073_v25 = vor.u32 %v1292_v35, %v1072_v34  ;;  %v1283_v55 = vld [vmem:[#allocation3 + $0xe4] sm:$0xf]  ;;  %v1042_v56 = vld [vmem:[#allocation3 + $0xe8] sm:$0xf0]  ;;  %v981_v57 = vor.u32 %v1267_v53, %v978_v54  ;;  %v970_v60 = vld [vmem:[#allocation3 + $0x58] sm:$0xf0] }
  0x25   :  { %607 = vmatpush.bf16.msra.mxu3 %v1161_v8  ;;  %v1045_v58 = vor.u32 %v1283_v55, %v1042_v56  ;;  %v1281_v61 = vld [vmem:[#allocation3 + $0xd4] sm:$0xf]  ;;  %v973_v62 = vor.u32 %v1265_v59, %v970_v60  ;;  %v1034_v63 = vld [vmem:[#allocation3 + $0xd8] sm:$0xf0]  ;;  %v1064_v1 = vld [vmem:[#allocation3 + $0x110] sm:$0xf] }
  0x26   :  { %571 = vmatpush.bf16.msra.mxu0 %v945_v23  ;;  %v1037_v0 = vor.u32 %v1281_v61, %v1034_v63  ;;  %v1290_v2 = vld [vmem:[#allocation3 + $0x114] sm:$0xf0]  ;;  %v1128_v3 = vld [vmem:[#allocation3 + $0x190] sm:$0xf]  ;;  %v1263_v6 = vld [vmem:[#allocation3 + $0x44] sm:$0xf] }
  0x27   :  { %584 = vmatpush.bf16.msra.mxu1 %v1009_v27  ;;  %v1065_v4 = vor.u32 %v1290_v2, %v1064_v1  ;;  %v1306_v5 = vld [vmem:[#allocation3 + $0x194] sm:$0xf0]  ;;  %v962_v7 = vld [vmem:[#allocation3 + $0x48] sm:$0xf0]  ;;  %v1279_v10 = vld [vmem:[#allocation3 + $0xc4] sm:$0xf] }
  0x28   :  { %595 = vmatpush.bf16.msra.mxu2 %v1089_v19  ;;  %v1129_v8 = vor.u32 %v1306_v5, %v1128_v3  ;;  %v965_v9 = vor.u32 %v1263_v6, %v962_v7  ;;  %v1026_v11 = vld [vmem:[#allocation3 + $0xc8] sm:$0xf0]  ;;  %v1056_v13 = vld [vmem:[#allocation3 + $0x100] sm:$0xf]  ;;  %v1288_v14 = vld [vmem:[#allocation3 + $0x104] sm:$0xf0] }
  0x29   :  { %608 = vmatpush.bf16.msra.mxu3 %v1153_v20  ;;  %v1029_v12 = vor.u32 %v1279_v10, %v1026_v11  ;;  %v1120_v15 = vld [vmem:[#allocation3 + $0x180] sm:$0xf]  ;;  %v1057_v16 = vor.u32 %v1288_v14, %v1056_v13  ;;  %v1304_v17 = vld [vmem:[#allocation3 + $0x184] sm:$0xf0]  ;;  %v1261_v18 = vld [vmem:[#allocation3 + $0x34] sm:$0xf] }
  0x2a   :  { %572 = vmatpush.bf16.msra.mxu0 %v937_v36  ;;  %v954_v19 = vld [vmem:[#allocation3 + $0x38] sm:$0xf0]  ;;  %v1121_v20 = vor.u32 %v1304_v17, %v1120_v15  ;;  %v1277_v22 = vld [vmem:[#allocation3 + $0xb4] sm:$0xf]  ;;  %v1275_v34 = vld [vmem:[#allocation3 + $0xa4] sm:$0xf] }
  0x2b   :  { %585 = vmatpush.bf16.msra.mxu1 %v1001_v39  ;;  %v957_v21 = vor.u32 %v1261_v18, %v954_v19  ;;  %v1018_v23 = vld [vmem:[#allocation3 + $0xb8] sm:$0xf0]  ;;  %v1301_v24 = vld [vmem:[#allocation3 + $0x174] sm:$0xf]  ;;  %v1010_v36 = vld [vmem:[#allocation3 + $0xa8] sm:$0xf0] }
  0x2c   :  { %596 = vmatpush.bf16.msra.mxu2 %v1081_v32  ;;  %v1021_v26 = vor.u32 %v1277_v22, %v1018_v23  ;;  %v1114_v27 = vld [vmem:[#allocation3 + $0x178] sm:$0xf0]  ;;  %v1317_v28 = vld [vmem:[#allocation3 + $0x1f4] sm:$0xf]  ;;  %v1259_v32 = vld [vmem:[#allocation3 + $0x24] sm:$0xf]  ;;  %v1013_v39 = vor.u32 %v1275_v34, %v1010_v36 }
  0x2d   :  { %609 = vmatpush.bf16.msra.mxu3 %v1145_v33  ;;  %v1178_v29 = vld [vmem:[#allocation3 + $0x1f8] sm:$0xf0]  ;;  %v1117_v30 = vor.u32 %v1301_v24, %v1114_v27  ;;  %v946_v33 = vld [vmem:[#allocation3 + $0x28] sm:$0xf0]  ;;  %v1299_v37 = vld [vmem:[#allocation3 + $0x164] sm:$0xf] }
  0x2e   :  { %573 = vmatpush.bf16.msra.mxu0 %v929_v49  ;;  %v1181_v31 = vor.u32 %v1317_v28, %v1178_v29  ;;  %v949_v35 = vor.u32 %v1259_v32, %v946_v33  ;;  %v1106_v38 = vld [vmem:[#allocation3 + $0x168] sm:$0xf0]  ;;  %v1315_v41 = vld [vmem:[#allocation3 + $0x1e4] sm:$0xf]  ;;  %v1257_v44 = vld [vmem:[#allocation3 + $0x14] sm:$0xf] }
  0x2f   :  { %586 = vmatpush.bf16.msra.mxu1 %v993_v50  ;;  %v1109_v40 = vor.u32 %v1299_v37, %v1106_v38  ;;  %v1170_v42 = vld [vmem:[#allocation3 + $0x1e8] sm:$0xf0]  ;;  %v938_v45 = vld [vmem:[#allocation3 + $0x18] sm:$0xf0]  ;;  %v1255_v55 = vld [vmem:[#allocation3 + $0x4] sm:$0xf] }
  0x30   :  { %597 = vmatpush.bf16.msra.mxu2 %v1073_v25  ;;  %v1173_v43 = vor.u32 %v1315_v41, %v1170_v42  ;;  %v1273_v25 = vld [vmem:[#allocation3 + $0x94] sm:$0xf]  ;;  %v941_v46 = vor.u32 %v1257_v44, %v938_v45  ;;  %v1002_v47 = vld [vmem:[#allocation3 + $0x98] sm:$0xf0]  ;;  %v930_v56 = vld [vmem:[#allocation3 + $0x8] sm:$0xf0] }
  0x31   :  { %610 = vmatpush.bf16.msra.mxu3 %v1137_v48  ;;  %v1297_v48 = vld [vmem:[#allocation3 + $0x154] sm:$0xf]  ;;  %v1098_v49 = vld [vmem:[#allocation3 + $0x158] sm:$0xf0]  ;;  %v1005_v50 = vor.u32 %v1273_v25, %v1002_v47  ;;  %v994_v59 = vld [vmem:[#allocation3 + $0x88] sm:$0xf0] }
  0x32   :  { %618 = vmatpush.bf16.msrb.mxu0 %v989_v51  ;;  %v1101_v51 = vor.u32 %v1297_v48, %v1098_v49  ;;  %v1162_v53 = vld [vmem:[#allocation3 + $0x1d8] sm:$0xf0]  ;;  %v1295_v60 = vld [vmem:[#allocation3 + $0x144] sm:$0xf]  ;;  %v1090_v61 = vld [vmem:[#allocation3 + $0x148] sm:$0xf0] }
  0x33   :  { %631 = vmatpush.bf16.msrb.mxu1 %v1053_v52  ;;  %v1313_v52 = vld [vmem:[#allocation3 + $0x1d4] sm:$0xf]  ;;  %v1093_v63 = vor.u32 %v1295_v60, %v1090_v61  ;;  %v1154_v1 = vld [vmem:[#allocation3 + $0x1c8] sm:$0xf0]  ;;  %v1146_v7 = vld [vmem:[#allocation3 + $0x1b8] sm:$0xf0] }
  0x34   :  { %598 = vmatpush.bf16.msra.mxu2 %v1065_v4  ;;  %v1165_v54 = vor.u32 %v1313_v52, %v1162_v53  ;;  %v1293_v3 = vld [vmem:[#allocation3 + $0x134] sm:$0xf]  ;;  %v1082_v4 = vld [vmem:[#allocation3 + $0x138] sm:$0xf0]  ;;  %v1074_v10 = vld [vmem:[#allocation3 + $0x128] sm:$0xf0] }
  0x35   :  { %611 = vmatpush.bf16.msra.mxu3 %v1129_v8  ;;  %v1309_v5 = vld [vmem:[#allocation3 + $0x1b4] sm:$0xf]  ;;  %v1085_v6 = vor.u32 %v1293_v3, %v1082_v4  ;;  %v1307_v11 = vld [vmem:[#allocation3 + $0x1a4] sm:$0xf]  ;;  %v1138_v13 = vld [vmem:[#allocation3 + $0x1a8] sm:$0xf0] }
  0x36   :  { %619 = vmatpush.bf16.msrb.mxu0 %v981_v57  ;;  %v1271_v57 = vld [vmem:[#allocation3 + $0x84] sm:$0xf]  ;;  %v1149_v8 = vor.u32 %v1309_v5, %v1146_v7  ;;  %v1141_v15 = vor.u32 %v1307_v11, %v1138_v13  ;;  %v1066_v17 = vld [vmem:[#allocation3 + $0x118] sm:$0xf0]  ;;  %v1305_v18 = vld [vmem:[#allocation3 + $0x194] sm:$0xf] }
  0x37   :  { %632 = vmatpush.bf16.msrb.mxu1 %v1045_v58  ;;  %v933_v58 = vor.u32 %v1255_v55, %v930_v56  ;;  %v1130_v19 = vld [vmem:[#allocation3 + $0x198] sm:$0xf0]  ;;  %v1058_v27 = vld [vmem:[#allocation3 + $0x108] sm:$0xf0]  ;;  %vm838_vm1 = vcmask 523264   ;;  %s880_s18 = sshll.u32 %s1593_s9, 4  ;;  %s881_s18 = int_to_ptr.hbm [resolvable:$true] %s880_s18 }
  0x38   :  { %599 = vmatpush.bf16.msra.mxu2 %v1057_v16  ;;  %v1289_v16 = vld [vmem:[#allocation3 + $0x114] sm:$0xf]  ;;  %v1133_v23 = vor.u32 %v1305_v18, %v1130_v19  ;;  %v1323_v55 = vld [vmem:[%s1589_s5 + $0x20] sm:$0xff]  ;;  %v1320_v60 = vld [vmem:[%s1589_s5 + $0x8] sm:$0xff]  ;;  %vm871_vm6 = vcmask 531968  }
  0x39   :  { %612 = vmatpush.bf16.msra.mxu3 %v1121_v20  ;;  %v1069_v22 = vor.u32 %v1289_v16, %v1066_v17  ;;  %v1326_v52 = vld [vmem:[%s1589_s5 + $0x38] sm:$0xff]  ;;  %v1325_v53 = vld [vmem:[%s1589_s5 + $0x30] sm:$0xff]  ;;  %v1332_v61 = vld [vmem:[%s1589_s5 + $0x68] sm:$0xff] }
  0x3a   :  { %620 = vmatpush.bf16.msrb.mxu0 %v973_v62  ;;  %v997_v62 = vor.u32 %v1271_v57, %v994_v59  ;;  %v1322_v56 = vld [vmem:[%s1589_s5 + $0x18] sm:$0xff]  ;;  %v1333_v59 = vld [vmem:[%s1589_s5 + $0x70] sm:$0xff]  ;;  %v1328_v4 = vld [vmem:[%s1589_s5 + $0x48] sm:$0xff] }
  0x3b   :  { %633 = vmatpush.bf16.msrb.mxu1 %v1037_v0  ;;  %v1311_v0 = vld [vmem:[#allocation3 + $0x1c4] sm:$0xf]  ;;  %v1334_v57 = vld [vmem:[%s1589_s5 + $0x78] sm:$0xff]  ;;  %v1329_v3 = vld [vmem:[%s1589_s5 + $0x50] sm:$0xff] }
  0x3c   :  { %644 = vmatpush.bf16.msrb.mxu2 %v1117_v30  ;;  %v1157_v2 = vor.u32 %v1311_v0, %v1154_v1  ;;  %v1303_v30 = vld [vmem:[#allocation3 + $0x184] sm:$0xf]  ;;  %v1330_v0 = vld [vmem:[%s1589_s5 + $0x58] sm:$0xff]  ;;  %v240_v7 = vld [vmem:[%s1588_s4] sm:$0x3] }
  0x3d   :  { %657 = vmatpush.bf16.msrb.mxu3 %v1181_v31  ;;  %v1122_v31 = vld [vmem:[#allocation3 + $0x188] sm:$0xf0] }
  0x3e   :  { %621 = vmatpush.bf16.msrb.mxu0 %v965_v9  ;;  %v1291_v9 = vld [vmem:[#allocation3 + $0x124] sm:$0xf]  ;;  %v1125_v36 = vor.u32 %v1303_v30, %v1122_v31 }
  0x3f   :  { %634 = vmatpush.bf16.msrb.mxu1 %v1029_v12  ;;  %v62_v12 = vld [vmem:[%s1586_s2] sm:$0xf]  ;;  %v1077_v14 = vor.u32 %v1291_v9, %v1074_v10  ;;  %v242_v9 = vperm.slane %v240_v7, 0 }
  0x40   :  { %645 = vmatpush.bf16.msrb.mxu2 %v1109_v40  ;;  %v64_v20 = vperm.slane %v62_v12, 0  ;;  %v66_v41 = vperm.slane %v62_v12, 2  ;;  %v67_v42 = vperm.slane %v62_v12, 3 }
  0x41   :  { %658 = vmatpush.bf16.msrb.mxu3 %v1173_v43 }
  0x42   :  { %622 = vmatpush.bf16.msrb.mxu0 %v957_v21  ;;  %v65_v21 = vperm.slane %v62_v12, 1 }
  0x43   :  { %635 = vmatpush.bf16.msrb.mxu1 %v1021_v26  ;;  %v1287_v26 = vld [vmem:[#allocation3 + $0x104] sm:$0xf] }
  0x44   :  { %646 = vmatpush.bf16.msrb.mxu2 %v1101_v51  ;;  %v1061_v34 = vor.u32 %v1287_v26, %v1058_v27 }
  0x45   :  { %659 = vmatpush.bf16.msrb.mxu3 %v1165_v54  ;;  %v1324_v54 = vld [vmem:[%s1589_s5 + $0x28] sm:$0xff] }
  0x46   :  { %623 = vmatpush.bf16.msrb.mxu0 %v949_v35 }
  0x47   :  { %636 = vmatpush.bf16.msrb.mxu1 %v1013_v39 }
  0x48   :  { %647 = vmatpush.bf16.msrb.mxu2 %v1093_v63  ;;  %v1331_v63 = vld [vmem:[%s1589_s5 + $0x60] sm:$0xff] }
  0x49   :  { %660 = vmatpush.bf16.msrb.mxu3 %v1157_v2 }
  0x4a   :  { %624 = vmatpush.bf16.msrb.mxu0 %v941_v46 }
  0x4b   :  { %637 = vmatpush.bf16.msrb.mxu1 %v1005_v50 }
  0x4c   :  { %648 = vmatpush.bf16.msrb.mxu2 %v1085_v6 }
  0x4d   :  { %661 = vmatpush.bf16.msrb.mxu3 %v1149_v8  ;;  %v1327_v8 = vld [vmem:[%s1589_s5 + $0x40] sm:$0xff] }
  0x4e   :  { %625 = vmatpush.bf16.msrb.mxu0 %v933_v58  ;;  %v1321_v58 = vld [vmem:[%s1589_s5 + $0x10] sm:$0xff] }
  0x4f   :  { %638 = vmatpush.bf16.msrb.mxu1 %v997_v62  ;;  %v1319_v62 = vld [vmem:[%s1589_s5] sm:$0xff] }
  0x50   :  { %649 = vmatpush.bf16.msrb.mxu2 %v1077_v14 }
  0x51   :  { %662 = vmatpush.bf16.msrb.mxu3 %v1141_v15 }
  0x54   :  { %650 = vmatpush.bf16.msrb.mxu2 %v1069_v22 }
  0x55   :  { %663 = vmatpush.bf16.msrb.mxu3 %v1133_v23 }
  0x58   :  { %651 = vmatpush.bf16.msrb.mxu2 %v1061_v34 }
  0x59   :  { %664 = vmatpush.bf16.msrb.mxu3 %v1125_v36 }
  0x96   :  { %v125_v24 = vpop.f32.mrf.mxu2 }
  0x97   :  { %v126_v28 = vadd.f32 %v125_v24, %v64_v20  ;;  %v138_v29 = vpop.f32.mrf.mxu3 }
  0x98   :  { %v139_v32 = vadd.f32 %v138_v29, %v65_v21  ;;  %v243_v21 = vperm.slane %v240_v7, 1 }
  0x99   :  { %v168_v33 = vmax.f32 %v126_v28, 0.0 }
  0x9a   :  { %v169_v35 = vmax.f32 %v139_v32, 0.0 }
  0x9b   :  { %v172_v37 = vpack.c.bf16 %v168_v33, %v168_v33 }
  0x9c   :  { %v173_v38 = vpack.c.bf16 %v169_v35, %v169_v35 }
  0x9d   :  { %574 = vmatmul.bf16.vlgmr.msra.gmra.mxu0 %v172_v37 }
  0x9e   :  { %587 = vmatmul.bf16.vlgmr.msra.gmra.mxu1 %v173_v38  ;;  %v127_v39 = vpop.f32.mrf.mxu2  ;;  %806 = vmatpush.bf16.msra.mxu0 %v1326_v52 }
  0x9f   :  { %v140_v40 = vpop.f32.mrf.mxu3  ;;  %819 = vmatpush.bf16.msra.mxu1 %v1334_v57 }
  0xa2   :  { %807 = vmatpush.bf16.msra.mxu0 %v1325_v53 }
  0xa3   :  { %820 = vmatpush.bf16.msra.mxu1 %v1333_v59 }
  0xa6   :  { %v151_v43 = vpop.f32.mrf.mxu2  ;;  %808 = vmatpush.bf16.msra.mxu0 %v1324_v54 }
  0xa7   :  { %v152_v44 = vadd.f32 %v151_v43, %v66_v41  ;;  %v164_v45 = vpop.f32.mrf.mxu3  ;;  %821 = vmatpush.bf16.msra.mxu1 %v1332_v61 }
  0xa8   :  { %v165_v25 = vadd.f32 %v164_v45, %v67_v42  ;;  %v1341_v42 = vld [vmem:[%s1591_s7] ss:$0 sm:$0xff]  ;;  %s1403_s7 = smov [#allocation6]  }
  0xa9   :  { %v170_v46 = vmax.f32 %v152_v44, 0.0  ;;  %s878_s15 = sshll.u32 %s1403_s7, 4  ;;  %s879_s15 = int_to_ptr.vmem [resolvable:$true] %s878_s15 }
  0xaa   :  { %v171_v47 = vmax.f32 %v165_v25, 0.0  ;;  %809 = vmatpush.bf16.msra.mxu0 %v1323_v55 }
  0xab   :  { %v174_v48 = vpack.c.bf16 %v170_v46, %v170_v46  ;;  %822 = vmatpush.bf16.msra.mxu1 %v1331_v63  ;;  %v1342_v46 = vld [vmem:[#allocation2] ss:$0 sm:$0xff] }
  0xac   :  { %v175_v49 = vpack.c.bf16 %v171_v47, %v171_v47 }
  0xad   :  { %600 = vmatmul.bf16.vlgmr.msra.gmra.mxu2 %v174_v48  ;;  %626 = vmatmul.bf16.vlgmr.msrb.gmra.mxu0 %v172_v37 }
  0xae   :  { %613 = vmatmul.bf16.vlgmr.msra.gmra.mxu3 %v175_v49  ;;  %639 = vmatmul.bf16.vlgmr.msrb.gmra.mxu1 %v173_v38  ;;  %v153_v50 = vpop.f32.mrf.mxu2  ;;  %v1340_v38 = vld [vmem:[%s1590_s6] ss:$0 sm:$0xff]  ;;  %s1402_s6 = smov 64  }
  0xaf   :  { %v166_v51 = vpop.f32.mrf.mxu3  ;;  %810 = vmatpush.bf16.msra.mxu0 %v1322_v56  ;;  %823 = vmatpush.bf16.msra.mxu1 %v1330_v0 }
  0xb3   :  { %811 = vmatpush.bf16.msra.mxu0 %v1321_v58  ;;  %824 = vmatpush.bf16.msra.mxu1 %v1329_v3 }
  0xb7   :  { %812 = vmatpush.bf16.msra.mxu0 %v1320_v60  ;;  %825 = vmatpush.bf16.msra.mxu1 %v1328_v4 }
  0xbb   :  { %813 = vmatpush.bf16.msra.mxu0 %v1319_v62  ;;  %826 = vmatpush.bf16.msra.mxu1 %v1327_v8 }
  0xbd   :  { %652 = vmatmul.bf16.vlgmr.msrb.gmra.mxu2 %v174_v48 }
  0xbe   :  { %665 = vmatmul.bf16.vlgmr.msrb.gmra.mxu3 %v175_v49 }
 0x11a   :  { %v575_v1 = vpop.f32.mrf.mxu0 }
 0x11b   :  { %v588_v2 = vpop.f32.mrf.mxu1  ;;  %v576_v11 = vadd.f32 %v575_v1, %v242_v9 }
 0x11d   :  { %v589_v13 = vadd.f32 %v588_v2, %v576_v11 }
 0x122   :  { %v577_v5 = vpop.f32.mrf.mxu0 }
 0x123   :  { %v590_v6 = vpop.f32.mrf.mxu1 }
 0x12a   :  { %v627_v10 = vpop.f32.mrf.mxu0 }
 0x12b   :  { %v640_v12 = vpop.f32.mrf.mxu1  ;;  %v628_v26 = vadd.f32 %v627_v10, %v243_v21 }
 0x12d   :  { %v641_v27 = vadd.f32 %v640_v12, %v628_v26 }
 0x130   :  { %v601_v14 = vpop.f32.mrf.mxu2 }
 0x131   :  { %v602_v15 = vadd.f32 %v601_v14, %v589_v13  ;;  %v614_v16 = vpop.f32.mrf.mxu3 }
 0x132   :  { %v629_v17 = vpop.f32.mrf.mxu0 }
 0x133   :  { %v615_v18 = vadd.f32 %v614_v16, %v602_v15  ;;  %v642_v19 = vpop.f32.mrf.mxu1 }
 0x135   :  { %v670_v20 = vmax.f32 %v615_v18, 0.0 }
 0x137   :  { %v672_v22 = vpack.c.bf16 %v670_v20, %v670_v20 }
 0x138   :  { %v603_v23 = vpop.f32.mrf.mxu2 }
 0x139   :  { %v616_v24 = vpop.f32.mrf.mxu3  ;;  %814 = vmatmul.bf16.vlgmr.msra.gmra.mxu0 %v672_v22 }
 0x140   :  { %v653_v28 = vpop.f32.mrf.mxu2 }
 0x141   :  { %v654_v29 = vadd.f32 %v653_v28, %v641_v27  ;;  %v666_v30 = vpop.f32.mrf.mxu3 }
 0x143   :  { %v667_v31 = vadd.f32 %v666_v30, %v654_v29 }
 0x145   :  { %v671_v32 = vmax.f32 %v667_v31, 0.0 }
 0x147   :  { %v673_v33 = vpack.c.bf16 %v671_v32, %v671_v32 }
 0x148   :  { %v655_v34 = vpop.f32.mrf.mxu2 }
 0x149   :  { %v668_v35 = vpop.f32.mrf.mxu3  ;;  %827 = vmatmul.bf16.vlgmr.msra.gmra.mxu1 %v673_v33 }
 0x1b6   :  { %v815_v36 = vpop.f32.mrf.mxu0 }
 0x1b7   :  { %v816_v39 = vadd.f32 %v1340_v38, %v815_v36 }
 0x1be   :  { %v817_v37 = vpop.f32.mrf.mxu0 }
 0x1c6   :  { %v828_v40 = vpop.f32.mrf.mxu1 }
 0x1c7   :  { %v829_v41 = vadd.f32 %v828_v40, %v816_v39 }
 0x1c9   :  { %v832_v43 = vmax.f32 %v829_v41, 0.0 }
 0x1cb   :  { %v837_v44 = vmul.f32 %v1341_v42, %v832_v43  ;;  %866 = vst.msk [vmem:[#allocation6] sm:$0xff] %vm838_vm1, %v832_v43 }
 0x1cd   :  { %v839_v45 = vsel %vm838_vm1, %v837_v44, 0.0 }
 0x1ce   :  { %v830_v25 = vpop.f32.mrf.mxu1  ;;  %840 = vadd.xlane.f32.xlu0 %v839_v45 }
 0x241   :  { %v841_v47 = vpop.xlane.xlu0 %840 }
 0x242   :  { %v846_v48 = vadd.f32 %v1342_v46, %v841_v47 }
 0x244   :  { %v1246_v49 = vmul.f32 -1.442695, %v846_v48 }
 0x246   :  { %1343 = vpow2.f32 %v1246_v49 }
 0x24c   :  { %v1344_v50 = vpop.eup %1343 }
 0x24d   :  { %v850_v51 = vadd.f32 1.0, %v1344_v50 }
 0x24f   :  { %1345 = vrcp.f32 %v850_v51  ;;  %v862_v55 = vand.u32 2147483648, %v850_v51  ;;  %v860_v57 = vand.u32 2147483647, %v850_v51  ;;  %vm856_vm3 = vweird.f32 %v850_v51 }
 0x251   :  { %v863_v59 = vor.u32 1.1754944e-38, %v862_v55  ;;  %vm861_vm5 = vcmp.eq.f32.partialorder %v860_v57, 8.507059e+37 }
 0x255   :  { %v1346_v52 = vpop.eup %1345 }
 0x256   :  { %v852_v53 = vmul.f32 %v1346_v52, %v850_v51  ;;  %vm857_vm2 = vweird.f32 %v1346_v52 }
 0x257   :  { %vm858_vm4 = vmor %vm856_vm3, %vm857_vm2 }
 0x258   :  { %v853_v54 = vsub.f32 1.0, %v852_v53 }
 0x25a   :  { %v854_v56 = vmul.f32 %v1346_v52, %v853_v54 }
 0x25c   :  { %v855_v58 = vadd.f32 %v1346_v52, %v854_v56 }
 0x25e   :  { %v859_v60 = vsel %vm858_vm4, %v1346_v52, %v855_v58 }
 0x25f   :  { %v864_v61 = vsel %vm861_vm5, %v863_v59, %v859_v60 }
 0x260   :  { %868 = vrot.lane.b32.xlu0 %v864_v61, %s1402_s6 }
 0x2d2   :  { %v869_v62 = vpop.permute.xlu0 %868 }
 0x2d3   :  { %872 = vst.msk [vmem:[#allocation6] sm:$0xff] %vm871_vm6, %v869_v62 }
 0x2d4   :  { %883 = dma.vmem_to_hbm [thread:$0]  %s879_s15, 128, %s881_s18, [#allocation5]  }
 0x2d5   :  { %1397 = dma.done.wait [#allocation5], 128  }
 0x2d6   :  { %1398 = vsyncadd [#allocation5], 4294967168 }
 0x2d7   :  { %888 = vsyncpa [#allocation4], 1 }
 0x2d8   :  { %889 = vsyncpa [#allocation5], 1 }

</bundles_post_ra>
